<compile_context>
chip_gen: v6e
topology: v6e:2x2x1
jax: 0.10.0
libtpu: 0.0.40
codegen_flags: <defaults>
</compile_context>

<pallas_src>
import jax
import jax.numpy as jnp
from jax import lax
from jax.experimental import pallas as pl
from jax.experimental.pallas import tpu as pltpu

NEG_SLOPE = 0.01  # torch.nn.LeakyReLU default negative_slope


def _leaky_relu(x):
    return jnp.where(x >= 0, x, NEG_SLOPE * x)


def _round_up(x, m):
    return (x + m - 1) // m * m


def _default_compute_dtype():
    """bf16 on v6e/v7x (native MXU dtype), f32 elsewhere (v5e & friends)."""
    try:
        kind = jax.devices()[0].device_kind.lower()
    except Exception:  # pragma: no cover - be conservative if query fails
        return jnp.float32
    if "v6" in kind or "v7" in kind:
        return jnp.bfloat16
    return jnp.float32


def qmix_ff_kernel(qs_ref, st_ref, wfs_ref, wfa_ref, wmid_ref, wout_ref,
                   b_ref, out_ref):
    """Inputs are batch-major ([tile_b, feat]); activations are [feat, tile_b]."""
    H = wfa_ref.shape[0]
    cdt = qs_ref.dtype                           # compute dtype (f32 or bf16)
    # Contract dim 1 of both operands: W[f, k] . X[b, k] -> [f, b] on the MXU.
    dn = (((1,), (1,)), ((), ()))

    b1 = b_ref[0:H, :]                           # [H, 1]   ff_net layer-1 bias
    bb1 = b_ref[H:2 * H, :]                      # [H, 1]   ff_net_bias layer-1 bias
    b2 = b_ref[2 * H:3 * H, :]                   # [H, 1]
    b3 = b_ref[3 * H:4 * H, :]                   # [H, 1]
    c = b_ref[4 * H:4 * H + 1, :]                # [1, 1]   b4 + bb2 folded

    # Fused first layer over the state features (both branches): [2H, tile_b]
    hs = lax.dot_general(wfs_ref[...], st_ref[...], dn,
                         preferred_element_type=jnp.float32)
    # Agent-Q contribution for the ff_net branch only: [H, tile_b]
    ha = lax.dot_general(wfa_ref[...], qs_ref[...], dn,
                         preferred_element_type=jnp.float32)

    h = _leaky_relu(hs[:H, :] + ha + b1)         # ff_net layer-1 activations
    hb = _leaky_relu(hs[H:, :] + bb1)            # ff_net_bias layer-1 activations

    # ff_net hidden layers 2 and 3 (weights stacked in one [2H, H] block)
    w2 = wmid_ref[0:H, :]
    w3 = wmid_ref[H:2 * H, :]
    h = _leaky_relu(jnp.dot(w2, h.astype(cdt),
                            preferred_element_type=jnp.float32) + b2)
    h = _leaky_relu(jnp.dot(w3, h.astype(cdt),
                            preferred_element_type=jnp.float32) + b3)

    # Output stage: w4 @ h3 + wb2 @ hb + (b4 + bb2), stored directly as a
    # lane-dense, unmasked [1, tile_b] row (batch on lanes).
    w4 = wout_ref[0:1, :]
    wb2 = wout_ref[1:2, :]
    y = (jnp.dot(w4, h.astype(cdt), preferred_element_type=jnp.float32)
         + jnp.dot(wb2, hb.astype(cdt), preferred_element_type=jnp.float32)
         + c)
    out_ref[...] = y                             # [1, tile_b]


def pack_params(torch_params, n_agents, dim_state, dim_hidden):
    """Pack torch-convention ([out,in] weights, [out] biases) params for the kernel."""
    (w1, b1, w2, b2, w3, b3, w4, b4, wb1, bb1, wb2, bb2) = torch_params
    H = dim_hidden
    w1_a = w1[:, :n_agents]                                   # [H, A]
    w1_s = w1[:, n_agents:]                                   # [H, S]
    w_fs = jnp.concatenate([w1_s, wb1], axis=0)               # [2H, S] state weights
    w_fa = w1_a                                               # [H, A]  agent weights
    w_mid = jnp.concatenate([w2, w3], axis=0)                 # [2H, H] (w2 ; w3)
    w_out = jnp.concatenate([w4.reshape(1, H),
                             wb2.reshape(1, H)], axis=0)      # [2, H]  (w4 ; wb2)
    c = (b4 + bb2).reshape(1)
    b_pack = jnp.concatenate([b1, bb1, b2, b3, c],
                             axis=0).reshape(4 * H + 1, 1).astype(jnp.float32)
    return (w_fs, w_fa, w_mid, w_out, b_pack)


def qmix_ff_mixer(values_n, states, packed_params, *, n_agents, dim_state,
                  tile_b=4096, compute_dtype=None):
    """values_n: [..., n_agents(, 1)], states: [..., dim_state] -> q_tot [B, 1]."""
    if compute_dtype is None:
        compute_dtype = _default_compute_dtype()

    qs = values_n.reshape(-1, n_agents).astype(compute_dtype)   # [B, A]
    st = states.reshape(-1, dim_state).astype(compute_dtype)    # [B, S]
    B = qs.shape[0]

    # 128-aligned lane-dense batch tile.  Balance the tile size across grid
    # steps to minimise padding; a >=2-step grid keeps the pipeline fed and
    # (via the "parallel" axis) shards across both TensorCores on v7x.
    tile_req = max(128, _round_up(int(tile_b), 128))
    B128 = _round_up(B, 128)
    if B128 <= tile_req:
        tile_b = B128
        n_steps = 1
    else:
        n_steps = -(-B128 // tile_req)
        tile_b = _round_up(-(-B128 // n_steps), 128)
    B_pad = tile_b * n_steps

    if B_pad != B:
        qs = jnp.pad(qs, ((0, B_pad - B), (0, 0)))
        st = jnp.pad(st, ((0, B_pad - B), (0, 0)))

    (w_fs, w_fa, w_mid, w_out, b_pack) = packed_params
    w_fs, w_fa, w_mid, w_out = (a.astype(compute_dtype)
                                for a in (w_fs, w_fa, w_mid, w_out))

    def fullp(arr):
        # Small parameter block, fully resident in VMEM for every grid step.
        return pl.BlockSpec(arr.shape, lambda i: (0, 0))

    out_row = pl.pallas_call(
        qmix_ff_kernel,
        out_shape=jax.ShapeDtypeStruct((1, B_pad), jnp.float32),
        grid_spec=pltpu.PrefetchScalarGridSpec(
            num_scalar_prefetch=0,
            grid=(n_steps,),
            in_specs=[
                pl.BlockSpec((tile_b, n_agents), lambda i: (i, 0)),   # qs tile
                pl.BlockSpec((tile_b, dim_state), lambda i: (i, 0)),  # st tile
                fullp(w_fs), fullp(w_fa), fullp(w_mid), fullp(w_out),
                fullp(b_pack),
            ],
            out_specs=pl.BlockSpec((1, tile_b), lambda i: (0, i)),
        ),
        compiler_params=pltpu.CompilerParams(
            dimension_semantics=("parallel",)),
    )(qs, st, w_fs, w_fa, w_mid, w_out, b_pack)

    return out_row.reshape(B_pad, 1)[:B]          # q_tot: [B, 1]


def init_params(key, n_agents, dim_state, dim_hidden):
    """Deterministic synthetic parameters, torch nn.Linear convention ([out, in])."""
    ks = jax.random.split(key, 6)

    def lin(k, fan_in, fan_out):
        bound = 1.0 / jnp.sqrt(fan_in)
        kw, kb = jax.random.split(k)
        w = jax.random.uniform(kw, (fan_out, fan_in), jnp.float32, -bound, bound)
        b = jax.random.uniform(kb, (fan_out,), jnp.float32, -bound, bound)
        return w, b

    dim_input = n_agents + dim_state
    w1, b1 = lin(ks[0], dim_input, dim_hidden)
    w2, b2 = lin(ks[1], dim_hidden, dim_hidden)
    w3, b3 = lin(ks[2], dim_hidden, dim_hidden)
    w4, b4 = lin(ks[3], dim_hidden, 1)
    wb1, bb1 = lin(ks[4], dim_state, dim_hidden)
    wb2, bb2 = lin(ks[5], dim_hidden, 1)
    return (w1, b1, w2, b2, w3, b3, w4, b4, wb1, bb1, wb2, bb2)


def _reference(values_n, states, torch_params, n_agents, dim_state):
    (w1, b1, w2, b2, w3, b3, w4, b4, wb1, bb1, wb2, bb2) = torch_params
    qs = values_n.reshape(-1, n_agents)
    st = states.reshape(-1, dim_state)
    x = jnp.concatenate([qs, st], axis=-1)
    h = _leaky_relu(x @ w1.T + b1)
    h = _leaky_relu(h @ w2.T + b2)
    h = _leaky_relu(h @ w3.T + b3)
    out = h @ w4.T + b4
    hb = _leaky_relu(st @ wb1.T + bb1)
    bias = hb @ wb2.T + bb2
    return (out + bias).reshape(-1, 1)


if __name__ == "__main__":
    n_agents = 4
    dim_state = 16
    dim_hidden = 32
    batch = 16

    key = jax.random.PRNGKey(0)
    k_p, k_v, k_s = jax.random.split(key, 3)

    torch_params = init_params(k_p, n_agents, dim_state, dim_hidden)
    packed = pack_params(torch_params, n_agents, dim_state, dim_hidden)

    # values_n: [batch, n_agents, 1] (per-agent Q-values), states: [batch, dim_state]
    values_n = jax.random.normal(k_v, (batch, n_agents, 1), jnp.float32)
    states = jax.random.normal(k_s, (batch, dim_state), jnp.float32)
    ref = _reference(values_n, states, torch_params, n_agents, dim_state)

    # 1) Strict f32 compute path: must match the f32 reference to 1e-5.
    q_f32 = qmix_ff_mixer(values_n, states, packed, n_agents=n_agents,
                          dim_state=dim_state, compute_dtype=jnp.float32)
    q_f32 = jax.block_until_ready(q_f32)
    assert q_f32.shape == (batch, 1)
    assert jnp.allclose(q_f32, ref, atol=1e-5, rtol=1e-5)

    # 2) Default compute path (bf16 on v6e/v7x, f32 elsewhere); bf16 uses a
    #    relaxed tolerance since inputs/weights are rounded to bf16.
    cdt = _default_compute_dtype()
    q_def = qmix_ff_mixer(values_n, states, packed,
                          n_agents=n_agents, dim_state=dim_state)
    q_def = jax.block_until_ready(q_def)
    tol = 1e-5 if cdt == jnp.float32 else 5e-2
    assert jnp.allclose(q_def, ref, atol=tol, rtol=tol)

    # 3) Non-aligned batch exercising zero-padding and a multi-step parallel grid.
    big_b = 1000
    kv2, ks2 = jax.random.split(jax.random.PRNGKey(1))
    v2 = jax.random.normal(kv2, (big_b, n_agents, 1), jnp.float32)
    s2 = jax.random.normal(ks2, (big_b, dim_state), jnp.float32)
    ref2 = _reference(v2, s2, torch_params, n_agents, dim_state)
    q2 = qmix_ff_mixer(v2, s2, packed, n_agents=n_agents, dim_state=dim_state,
                       tile_b=512, compute_dtype=jnp.float32)
    q2 = jax.block_until_ready(q2)
    assert q2.shape == (big_b, 1)
    assert jnp.allclose(q2, ref2, atol=1e-5, rtol=1e-5)

    print("KERNEL_OK")
</pallas_src>

<mosaic_0001>
module attributes {stable_mosaic.version = 11 : i64} {
  func.func @qmix_ff_kernel(%arg0: i32, %arg1: memref<128x4xf32, #tpu.memory_space<vmem>>, %arg2: memref<128x16xf32, #tpu.memory_space<vmem>>, %arg3: memref<64x16xf32, #tpu.memory_space<vmem>>, %arg4: memref<32x4xf32, #tpu.memory_space<vmem>>, %arg5: memref<64x32xf32, #tpu.memory_space<vmem>>, %arg6: memref<2x32xf32, #tpu.memory_space<vmem>>, %arg7: memref<129x1xf32, #tpu.memory_space<vmem>>, %arg8: memref<1x128xf32, #tpu.memory_space<vmem>>) attributes {dimension_semantics = [#tpu.dimension_semantics<parallel>], iteration_bounds = array<i64: 1>, scalar_prefetch = 0 : i64, scratch_operands = 0 : i64, tpu.core_type = #tpu.core_type<tc>, window_params = [{transform_indices = @transform_0, window_bounds = array<i64: 128, 4>}, {transform_indices = @transform_1, window_bounds = array<i64: 128, 16>}, {pipeline_mode = #tpu.pipeline_mode<synchronous>, transform_indices = @transform_2, window_bounds = array<i64: 64, 16>}, {pipeline_mode = #tpu.pipeline_mode<synchronous>, transform_indices = @transform_3, window_bounds = array<i64: 32, 4>}, {pipeline_mode = #tpu.pipeline_mode<synchronous>, transform_indices = @transform_4, window_bounds = array<i64: 64, 32>}, {pipeline_mode = #tpu.pipeline_mode<synchronous>, transform_indices = @transform_5, window_bounds = array<i64: 2, 32>}, {pipeline_mode = #tpu.pipeline_mode<synchronous>, transform_indices = @transform_6, window_bounds = array<i64: 129, 1>}, {transform_indices = @transform_7, window_bounds = array<i64: 1, 128>}]} {
    %c0 = arith.constant 0 : index
    %c0_0 = arith.constant 0 : index
    %0 = vector.load %arg7[%c0, %c0_0] : memref<129x1xf32, #tpu.memory_space<vmem>>, vector<32x1xf32>
    %c32 = arith.constant 32 : index
    %c0_1 = arith.constant 0 : index
    %1 = vector.load %arg7[%c32, %c0_1] : memref<129x1xf32, #tpu.memory_space<vmem>>, vector<32x1xf32>
    %c64 = arith.constant 64 : index
    %c0_2 = arith.constant 0 : index
    %2 = vector.load %arg7[%c64, %c0_2] : memref<129x1xf32, #tpu.memory_space<vmem>>, vector<32x1xf32>
    %c96 = arith.constant 96 : index
    %c0_3 = arith.constant 0 : index
    %3 = vector.load %arg7[%c96, %c0_3] : memref<129x1xf32, #tpu.memory_space<vmem>>, vector<32x1xf32>
    %c128 = arith.constant 128 : index
    %c0_4 = arith.constant 0 : index
    %4 = vector.load %arg7[%c128, %c0_4] : memref<129x1xf32, #tpu.memory_space<vmem>>, vector<1x1xf32>
    %c0_5 = arith.constant 0 : index
    %c0_6 = arith.constant 0 : index
    %5 = vector.load %arg3[%c0_5, %c0_6] : memref<64x16xf32, #tpu.memory_space<vmem>>, vector<64x16xf32>
    %c0_7 = arith.constant 0 : index
    %c0_8 = arith.constant 0 : index
    %6 = vector.load %arg2[%c0_7, %c0_8] : memref<128x16xf32, #tpu.memory_space<vmem>>, vector<128x16xf32>
    %cst = arith.constant dense<0.000000e+00> : vector<64x128xf32>
    %7 = tpu.matmul %5, %6, %cst {dimension_numbers = #tpu.dot_dimension_numbers<[1], [1], [0], [0], [0, 0, 1, 0], [], []>} : vector<64x16xf32>, vector<128x16xf32>, vector<64x128xf32> -> vector<64x128xf32>
    %c0_9 = arith.constant 0 : index
    %c0_10 = arith.constant 0 : index
    %8 = vector.load %arg4[%c0_9, %c0_10] : memref<32x4xf32, #tpu.memory_space<vmem>>, vector<32x4xf32>
    %c0_11 = arith.constant 0 : index
    %c0_12 = arith.constant 0 : index
    %9 = vector.load %arg1[%c0_11, %c0_12] : memref<128x4xf32, #tpu.memory_space<vmem>>, vector<128x4xf32>
    %cst_13 = arith.constant dense<0.000000e+00> : vector<32x128xf32>
    %10 = tpu.matmul %8, %9, %cst_13 {dimension_numbers = #tpu.dot_dimension_numbers<[1], [1], [0], [0], [0, 0, 1, 0], [], []>} : vector<32x4xf32>, vector<128x4xf32>, vector<32x128xf32> -> vector<32x128xf32>
    %11 = vector.extract_strided_slice %7 {offsets = [0, 0], sizes = [32, 128], strides = [1, 1]} : vector<64x128xf32> to vector<32x128xf32>
    %12 = arith.addf %11, %10 : vector<32x128xf32>
    %13 = vector.broadcast %0 : vector<32x1xf32> to vector<32x128xf32>
    %14 = arith.addf %12, %13 : vector<32x128xf32>
    %cst_14 = arith.constant 0.000000e+00 : f32
    %15 = vector.broadcast %cst_14 : f32 to vector<32x128xf32>
    %16 = arith.cmpf oge, %14, %15 : vector<32x128xf32>
    %cst_15 = arith.constant 0.00999999977 : f32
    %17 = vector.broadcast %cst_15 : f32 to vector<32x128xf32>
    %18 = arith.mulf %17, %14 : vector<32x128xf32>
    %19 = arith.select %16, %14, %18 : vector<32x128xi1>, vector<32x128xf32>
    %20 = vector.extract_strided_slice %7 {offsets = [32, 0], sizes = [32, 128], strides = [1, 1]} : vector<64x128xf32> to vector<32x128xf32>
    %21 = vector.broadcast %1 : vector<32x1xf32> to vector<32x128xf32>
    %22 = arith.addf %20, %21 : vector<32x128xf32>
    %cst_16 = arith.constant 0.000000e+00 : f32
    %23 = vector.broadcast %cst_16 : f32 to vector<32x128xf32>
    %24 = arith.cmpf oge, %22, %23 : vector<32x128xf32>
    %cst_17 = arith.constant 0.00999999977 : f32
    %25 = vector.broadcast %cst_17 : f32 to vector<32x128xf32>
    %26 = arith.mulf %25, %22 : vector<32x128xf32>
    %27 = arith.select %24, %22, %26 : vector<32x128xi1>, vector<32x128xf32>
    %c0_18 = arith.constant 0 : index
    %c0_19 = arith.constant 0 : index
    %28 = vector.load %arg5[%c0_18, %c0_19] : memref<64x32xf32, #tpu.memory_space<vmem>>, vector<32x32xf32>
    %c32_20 = arith.constant 32 : index
    %c0_21 = arith.constant 0 : index
    %29 = vector.load %arg5[%c32_20, %c0_21] : memref<64x32xf32, #tpu.memory_space<vmem>>, vector<32x32xf32>
    %cst_22 = arith.constant dense<0.000000e+00> : vector<32x128xf32>
    %30 = tpu.matmul %28, %19, %cst_22 {dimension_numbers = #tpu.dot_dimension_numbers<[1], [0], [0], [1], [0, 0, 1, 1], [], []>} : vector<32x32xf32>, vector<32x128xf32>, vector<32x128xf32> -> vector<32x128xf32>
    %31 = vector.broadcast %2 : vector<32x1xf32> to vector<32x128xf32>
    %32 = arith.addf %30, %31 : vector<32x128xf32>
    %cst_23 = arith.constant 0.000000e+00 : f32
    %33 = vector.broadcast %cst_23 : f32 to vector<32x128xf32>
    %34 = arith.cmpf oge, %32, %33 : vector<32x128xf32>
    %cst_24 = arith.constant 0.00999999977 : f32
    %35 = vector.broadcast %cst_24 : f32 to vector<32x128xf32>
    %36 = arith.mulf %35, %32 : vector<32x128xf32>
    %37 = arith.select %34, %32, %36 : vector<32x128xi1>, vector<32x128xf32>
    %cst_25 = arith.constant dense<0.000000e+00> : vector<32x128xf32>
    %38 = tpu.matmul %29, %37, %cst_25 {dimension_numbers = #tpu.dot_dimension_numbers<[1], [0], [0], [1], [0, 0, 1, 1], [], []>} : vector<32x32xf32>, vector<32x128xf32>, vector<32x128xf32> -> vector<32x128xf32>
    %39 = vector.broadcast %3 : vector<32x1xf32> to vector<32x128xf32>
    %40 = arith.addf %38, %39 : vector<32x128xf32>
    %cst_26 = arith.constant 0.000000e+00 : f32
    %41 = vector.broadcast %cst_26 : f32 to vector<32x128xf32>
    %42 = arith.cmpf oge, %40, %41 : vector<32x128xf32>
    %cst_27 = arith.constant 0.00999999977 : f32
    %43 = vector.broadcast %cst_27 : f32 to vector<32x128xf32>
    %44 = arith.mulf %43, %40 : vector<32x128xf32>
    %45 = arith.select %42, %40, %44 : vector<32x128xi1>, vector<32x128xf32>
    %c0_28 = arith.constant 0 : index
    %c0_29 = arith.constant 0 : index
    %46 = vector.load %arg6[%c0_28, %c0_29] : memref<2x32xf32, #tpu.memory_space<vmem>>, vector<1x32xf32>
    %c1 = arith.constant 1 : index
    %c0_30 = arith.constant 0 : index
    %47 = vector.load %arg6[%c1, %c0_30] : memref<2x32xf32, #tpu.memory_space<vmem>>, vector<1x32xf32>
    %cst_31 = arith.constant dense<0.000000e+00> : vector<1x128xf32>
    %48 = tpu.matmul %46, %45, %cst_31 {dimension_numbers = #tpu.dot_dimension_numbers<[1], [0], [0], [1], [0, 0, 1, 1], [], []>} : vector<1x32xf32>, vector<32x128xf32>, vector<1x128xf32> -> vector<1x128xf32>
    %cst_32 = arith.constant dense<0.000000e+00> : vector<1x128xf32>
    %49 = tpu.matmul %47, %27, %cst_32 {dimension_numbers = #tpu.dot_dimension_numbers<[1], [0], [0], [1], [0, 0, 1, 1], [], []>} : vector<1x32xf32>, vector<32x128xf32>, vector<1x128xf32> -> vector<1x128xf32>
    %50 = arith.addf %48, %49 : vector<1x128xf32>
    %51 = vector.broadcast %4 : vector<1x1xf32> to vector<1x128xf32>
    %52 = arith.addf %50, %51 : vector<1x128xf32>
    %c0_33 = arith.constant 0 : index
    %c0_34 = arith.constant 0 : index
    %53 = vector.load %arg8[%c0_33, %c0_34] : memref<1x128xf32, #tpu.memory_space<vmem>>, vector<1x128xf32>
    tpu.vector_store %arg8[%c0_33, %c0_34], %52 {strides = array<i32>} : memref<1x128xf32, #tpu.memory_space<vmem>>, vector<1x128xf32>,
    return
  }
  func.func @transform_0(%arg0: i32) -> (i32, i32) {
    %c0_i32 = arith.constant 0 : i32
    %c0_i32_0 = arith.constant 0 : i32
    return %arg0, %c0_i32 : i32, i32
  }
  func.func @transform_1(%arg0: i32) -> (i32, i32) {
    %c0_i32 = arith.constant 0 : i32
    %c0_i32_0 = arith.constant 0 : i32
    return %arg0, %c0_i32 : i32, i32
  }
  func.func @transform_2(%arg0: i32) -> (i32, i32) {
    %c0_i32 = arith.constant 0 : i32
    %c0_i32_0 = arith.constant 0 : i32
    %c0_i32_1 = arith.constant 0 : i32
    return %c0_i32, %c0_i32_0 : i32, i32
  }
  func.func @transform_3(%arg0: i32) -> (i32, i32) {
    %c0_i32 = arith.constant 0 : i32
    %c0_i32_0 = arith.constant 0 : i32
    %c0_i32_1 = arith.constant 0 : i32
    return %c0_i32, %c0_i32_0 : i32, i32
  }
  func.func @transform_4(%arg0: i32) -> (i32, i32) {
    %c0_i32 = arith.constant 0 : i32
    %c0_i32_0 = arith.constant 0 : i32
    %c0_i32_1 = arith.constant 0 : i32
    return %c0_i32, %c0_i32_0 : i32, i32
  }
  func.func @transform_5(%arg0: i32) -> (i32, i32) {
    %c0_i32 = arith.constant 0 : i32
    %c0_i32_0 = arith.constant 0 : i32
    %c0_i32_1 = arith.constant 0 : i32
    return %c0_i32, %c0_i32_0 : i32, i32
  }
  func.func @transform_6(%arg0: i32) -> (i32, i32) {
    %c0_i32 = arith.constant 0 : i32
    %c0_i32_0 = arith.constant 0 : i32
    %c0_i32_1 = arith.constant 0 : i32
    return %c0_i32, %c0_i32_0 : i32, i32
  }
  func.func @transform_7(%arg0: i32) -> (i32, i32) {
    %c0_i32 = arith.constant 0 : i32
    %c0_i32_0 = arith.constant 0 : i32
    return %c0_i32, %arg0 : i32, i32
  }
}

</mosaic_0001>

<bundles_post_ra>
// kernel: tpu_custom_call.1
= control target key start
LH: loop header
LB: loop body
LE: loop exit
PB: predicated region body
PF: predicated region fallthrough
CT: control target
= control target key end

     0   :  { %vm68_vm0 = vcmask 130048   ;;  %vm266_vm1 = vcmask 31744   ;;  %v1208_v6 = vmov 0   ;;  %s1570_s0 = inlined_call_operand.vmem [shape: f32[128,4], index: 0, kind: input, shape index: {}]   ;;  %s1571_s1 = inlined_call_operand.vmem [shape: f32[128,16], index: 1, kind: input, shape index: {}]   ;;  %s1572_s2 = inlined_call_operand.vmem [shape: f32[64,16], index: 2, kind: input, shape index: {}]   ;;  %s1573_s3 = inlined_call_operand.vmem [shape: f32[32,4], index: 3, kind: input, shape index: {}]   ;;  %s1574_s4 = inlined_call_operand.vmem [shape: f32[64,32], index: 4, kind: input, shape index: {}]   ;;  %s1575_s5 = inlined_call_operand.vmem [shape: f32[2,32], index: 5, kind: input, shape index: {}]   ;;  %s1576_s6 = inlined_call_operand.vmem [shape: f32[129,1], index: 6, kind: input, shape index: {}]   ;;  %s1577_s7 = inlined_call_operand.hbm [shape: f32[1,128], index: 7, kind: output, shape index: {}]  }
   0x1   :  { %v67_v0 = vld [vmem:[%s1571_s1 + $0x78] sm:$0xff]  ;;  %v66_v2 = vld [vmem:[%s1571_s1 + $0x70] sm:$0xff]  ;;  %v65_v4 = vld [vmem:[%s1571_s1 + $0x68] sm:$0xff]  ;;  %1184 = vset.pattern.permute.xlu0 %v1208_v6  ;;  %1185 = vset.pattern.permute.xlu1 %v1208_v6 }
   0x2   :  { %v265_v1 = vld [vmem:[%s1570_s0 + $0x78] sm:$0xff]  ;;  %1048 = vmatprep.subr.msk.mxu0 %vm68_vm0, %v67_v0  ;;  %v264_v3 = vld [vmem:[%s1570_s0 + $0x70] sm:$0xff]  ;;  %v263_v5 = vld [vmem:[%s1570_s0 + $0x68] sm:$0xff] }
   0x3   :  { %1092 = vmatprep.subr.msk.mxu1 %vm266_vm1, %v265_v1  ;;  %1049 = vmatpush3.xpose.msk.msra.mxu0 %vm68_vm0, %v67_v0  ;;  %v64_v7 = vld [vmem:[%s1571_s1 + $0x60] sm:$0xff]  ;;  %v63_v11 = vld [vmem:[%s1571_s1 + $0x58] sm:$0xff]  ;;  %v28_v14 = vld [vmem:[%s1576_s6 + $0x8] sm:$0xff] }
   0x4   :  { %1093 = vmatpush3.xpose.msk.msra.mxu1 %vm266_vm1, %v265_v1  ;;  %1050 = vmatprep.subr.msk.mxu0 %vm68_vm0, %v66_v2  ;;  %v262_v8 = vld [vmem:[%s1570_s0 + $0x60] sm:$0xff]  ;;  %v261_v12 = vld [vmem:[%s1570_s0 + $0x58] sm:$0xff]  ;;  %v62_v15 = vld [vmem:[%s1571_s1 + $0x50] sm:$0xff] }
   0x5   :  { %1094 = vmatprep.subr.msk.mxu1 %vm266_vm1, %v264_v3  ;;  %v44_v9 = vld [vmem:[%s1572_s2] sm:$0xff]  ;;  %v30_v13 = vld [vmem:[%s1576_s6 + $0x18] sm:$0xff]  ;;  %v260_v16 = vld [vmem:[%s1570_s0 + $0x50] sm:$0xff]  ;;  %423 = vperm.xlu1 %1185, %v28_v14  }
   0x6   :  { %v246_v10 = vld [vmem:[%s1573_s3] sm:$0xff]  ;;  %1080 = vmatprep.mubr.msk.f32.mxu0 %vm68_vm0, %v44_v9  ;;  %433 = vperm.xlu0 %1184, %v30_v13   ;;  %v29_v17 = vld [vmem:[%s1576_s6 + $0x10] sm:$0xff]  ;;  %v61_v19 = vld [vmem:[%s1571_s1 + $0x48] sm:$0xff] }
   0x7   :  { %1051 = vmatpush3.xpose.msk.msra.mxu0 %vm68_vm0, %v66_v2  ;;  %1124 = vmatprep.mubr.msk.f32.mxu1 %vm266_vm1, %v246_v10  ;;  %v27_v18 = vld [vmem:[%s1576_s6] sm:$0xff]  ;;  %v259_v20 = vld [vmem:[%s1570_s0 + $0x48] sm:$0xff] }
   0x8   :  { %1095 = vmatpush3.xpose.msk.msra.mxu1 %vm266_vm1, %v264_v3  ;;  %1052 = vmatprep.subr.msk.mxu0 %vm68_vm0, %v65_v4 }
   0x9   :  { %1096 = vmatprep.subr.msk.mxu1 %vm266_vm1, %v263_v5  ;;  %418 = vperm.xlu1 %1185, %v27_v18  }
   0xa   :  { %428 = vperm.xlu0 %1184, %v29_v17  }
   0xb   :  { %1053 = vmatpush3.xpose.msk.msra.mxu0 %vm68_vm0, %v65_v4 }
   0xc   :  { %1097 = vmatpush3.xpose.msk.msra.mxu1 %vm266_vm1, %v263_v5  ;;  %1054 = vmatprep.subr.msk.mxu0 %vm68_vm0, %v64_v7 }
   0xd   :  { %1098 = vmatprep.subr.msk.mxu1 %vm266_vm1, %v262_v8 }
   0xf   :  { %1055 = vmatpush3.xpose.msk.msra.mxu0 %vm68_vm0, %v64_v7 }
  0x10   :  { %1099 = vmatpush3.xpose.msk.msra.mxu1 %vm266_vm1, %v262_v8  ;;  %1056 = vmatprep.subr.msk.mxu0 %vm68_vm0, %v63_v11 }
  0x11   :  { %1100 = vmatprep.subr.msk.mxu1 %vm266_vm1, %v261_v12 }
  0x13   :  { %1057 = vmatpush3.xpose.msk.msra.mxu0 %vm68_vm0, %v63_v11 }
  0x14   :  { %1101 = vmatpush3.xpose.msk.msra.mxu1 %vm266_vm1, %v261_v12  ;;  %1058 = vmatprep.subr.msk.mxu0 %vm68_vm0, %v62_v15 }
  0x15   :  { %1102 = vmatprep.subr.msk.mxu1 %vm266_vm1, %v260_v16 }
  0x16   :  { %12 = vsyncpa [#allocation3], 0  ;;  %v38_v21 = vld [vmem:[%s1576_s6 + $0x58] sm:$0xff]  ;;  %v37_v22 = vld [vmem:[%s1576_s6 + $0x50] sm:$0xff]  ;;  %vm516_vm2 = vcmask 261120   ;;  %vm1210_vm15 = vmmov 0  }
  0x17   :  { %1059 = vmatpush3.xpose.msk.msra.mxu0 %vm68_vm0, %v62_v15  ;;  %v60_v23 = vld [vmem:[%s1571_s1 + $0x40] sm:$0xff]  ;;  %513 = vperm.xlu0 %1184, %v38_v21   ;;  %v36_v25 = vld [vmem:[%s1576_s6 + $0x48] sm:$0xff]  ;;  %v59_v27 = vld [vmem:[%s1571_s1 + $0x38] sm:$0xff]  ;;  %s1211_s19 = smov [#allocation2]  }
  0x18   :  { %1103 = vmatpush3.xpose.msk.msra.mxu1 %vm266_vm1, %v260_v16  ;;  %1060 = vmatprep.subr.msk.mxu0 %vm68_vm0, %v61_v19  ;;  %v258_v24 = vld [vmem:[%s1570_s0 + $0x40] sm:$0xff]  ;;  %v257_v28 = vld [vmem:[%s1570_s0 + $0x38] sm:$0xff]  ;;  %v58_v31 = vld [vmem:[%s1571_s1 + $0x30] sm:$0xff]  ;;  %s916_s20 = sshll.u32 %s1211_s19, 4  ;;  %s917_s20 = int_to_ptr.vmem [resolvable:$true] %s916_s20 }
  0x19   :  { %1104 = vmatprep.subr.msk.mxu1 %vm266_vm1, %v259_v20  ;;  %508 = vperm.xlu1 %1185, %v37_v22   ;;  %v35_v26 = vld [vmem:[%s1576_s6 + $0x40] sm:$0xff]  ;;  %v34_v29 = vld [vmem:[%s1576_s6 + $0x38] sm:$0xff]  ;;  %v256_v32 = vld [vmem:[%s1570_s0 + $0x30] sm:$0xff]  ;;  %s1186_s21 = scalar_lea.vmem %s917_s20, 16  ;;  %p1191_p1 = scmp.lt.s32.totalorder %s917_s20, %s917_s20 }
  0x1a   :  { %v42_v30 = vld [vmem:[%s1576_s6 + $0x78] sm:$0xff]  ;;  %v33_v33 = vld [vmem:[%s1576_s6 + $0x30] sm:$0xff]  ;;  %v57_v35 = vld [vmem:[%s1571_s1 + $0x28] sm:$0xff]  ;;  %p1187_p0 = scmp.ne.s32.totalorder %s917_s20, %s1186_s21 }
  0x1b   :  { %1061 = vmatpush3.xpose.msk.msra.mxu0 %vm68_vm0, %v61_v19  ;;  %503 = vperm.xlu0 %1184, %v36_v25   ;;  %v41_v34 = vld [vmem:[%s1576_s6 + $0x70] sm:$0xff]  ;;  %v255_v36 = vld [vmem:[%s1570_s0 + $0x28] sm:$0xff]  ;;  %v56_v39 = vld [vmem:[%s1571_s1 + $0x20] sm:$0xff] }
  0x1c   :  { %1105 = vmatpush3.xpose.msk.msra.mxu1 %vm266_vm1, %v259_v20  ;;  %1062 = vmatprep.subr.msk.mxu0 %vm68_vm0, %v60_v23  ;;  %v32_v37 = vld [vmem:[%s1576_s6 + $0x28] sm:$0xff]  ;;  %v254_v40 = vld [vmem:[%s1570_s0 + $0x20] sm:$0xff]  ;;  %v55_v43 = vld [vmem:[%s1571_s1 + $0x18] sm:$0xff] }
  0x1d   :  { %1106 = vmatprep.subr.msk.mxu1 %vm266_vm1, %v258_v24  ;;  %498 = vperm.xlu1 %1185, %v35_v26   ;;  %v40_v38 = vld [vmem:[%s1576_s6 + $0x68] sm:$0xff]  ;;  %v31_v41 = vld [vmem:[%s1576_s6 + $0x20] sm:$0xff]  ;;  %v253_v44 = vld [vmem:[%s1570_s0 + $0x18] sm:$0xff] }
  0x1e   :  { %v39_v42 = vld [vmem:[%s1576_s6 + $0x60] sm:$0xff]  ;;  %v54_v46 = vld [vmem:[%s1571_s1 + $0x10] sm:$0xff]  ;;  %v53_v48 = vld [vmem:[%s1571_s1 + $0x8] sm:$0xff] }
  0x1f   :  { %1063 = vmatpush3.xpose.msk.msra.mxu0 %vm68_vm0, %v60_v23  ;;  %469 = vperm.xlu0 %1184, %v34_v29   ;;  %v43_v45 = vld [vmem:[%s1576_s6 + $0x80] sm:$0x1]  ;;  %v252_v47 = vld [vmem:[%s1570_s0 + $0x10] sm:$0xff]  ;;  %v251_v49 = vld [vmem:[%s1570_s0 + $0x8] sm:$0xff] }
  0x20   :  { %1107 = vmatpush3.xpose.msk.msra.mxu1 %vm266_vm1, %v258_v24  ;;  %1064 = vmatprep.subr.msk.mxu0 %vm68_vm0, %v59_v27  ;;  %v52_v50 = vld [vmem:[%s1571_s1] sm:$0xff]  ;;  %v45_v52 = vld [vmem:[%s1572_s2 + $0x8] sm:$0xff]  ;;  %v46_v54 = vld [vmem:[%s1572_s2 + $0x10] sm:$0xff] }
  0x21   :  { %1108 = vmatprep.subr.msk.mxu1 %vm266_vm1, %v257_v28  ;;  %643 = vperm.xlu1 %1185, %v42_v30   ;;  %v250_v51 = vld [vmem:[%s1570_s0] sm:$0xff]  ;;  %v247_v53 = vld [vmem:[%s1573_s3 + $0x8] sm:$0xff]  ;;  %v248_v55 = vld [vmem:[%s1573_s3 + $0x10] sm:$0xff] }
  0x22   :  { %v47_v56 = vld [vmem:[%s1572_s2 + $0x18] sm:$0xff]  ;;  %v48_v58 = vld [vmem:[%s1572_s2 + $0x20] sm:$0xff]  ;;  %v49_v59 = vld [vmem:[%s1572_s2 + $0x28] sm:$0xff] }
  0x23   :  { %1065 = vmatpush3.xpose.msk.msra.mxu0 %vm68_vm0, %v59_v27  ;;  %464 = vperm.xlu0 %1184, %v33_v33   ;;  %v249_v57 = vld [vmem:[%s1573_s3 + $0x18] sm:$0xff]  ;;  %v50_v60 = vld [vmem:[%s1572_s2 + $0x30] sm:$0xff]  ;;  %v488_v62 = vld [vmem:[%s1574_s4] sm:$0xff] }
  0x24   :  { %1109 = vmatpush3.xpose.msk.msra.mxu1 %vm266_vm1, %v257_v28  ;;  %1066 = vmatprep.subr.msk.mxu0 %vm68_vm0, %v58_v31  ;;  %v51_v61 = vld [vmem:[%s1572_s2 + $0x38] sm:$0xff] }
  0x25   :  { %1110 = vmatprep.subr.msk.mxu1 %vm266_vm1, %v256_v32  ;;  %638 = vperm.xlu1 %1185, %v41_v34  }
  0x27   :  { %1067 = vmatpush3.xpose.msk.msra.mxu0 %vm68_vm0, %v58_v31  ;;  %459 = vperm.xlu0 %1184, %v32_v37  }
  0x28   :  { %1111 = vmatpush3.xpose.msk.msra.mxu1 %vm266_vm1, %v256_v32  ;;  %1068 = vmatprep.subr.msk.mxu0 %vm68_vm0, %v57_v35 }
  0x29   :  { %1112 = vmatprep.subr.msk.mxu1 %vm266_vm1, %v255_v36  ;;  %633 = vperm.xlu1 %1185, %v40_v38  }
  0x2b   :  { %1069 = vmatpush3.xpose.msk.msra.mxu0 %vm68_vm0, %v57_v35  ;;  %454 = vperm.xlu0 %1184, %v31_v41   ;;  %v489_v41 = vld [vmem:[%s1574_s4 + $0x8] sm:$0xff] }
  0x2c   :  { %1113 = vmatpush3.xpose.msk.msra.mxu1 %vm266_vm1, %v255_v36  ;;  %1070 = vmatprep.subr.msk.mxu0 %vm68_vm0, %v56_v39 }
  0x2d   :  { %1114 = vmatprep.subr.msk.mxu1 %vm266_vm1, %v254_v40  ;;  %628 = vperm.xlu1 %1185, %v39_v42  }
  0x2f   :  { %1071 = vmatpush3.xpose.msk.msra.mxu0 %vm68_vm0, %v56_v39  ;;  %905 = vperm.xlu0 %1184, %v43_v45  }
  0x30   :  { %1115 = vmatpush3.xpose.msk.msra.mxu1 %vm266_vm1, %v254_v40  ;;  %1072 = vmatprep.subr.msk.mxu0 %vm68_vm0, %v55_v43 }
  0x31   :  { %1116 = vmatprep.subr.msk.mxu1 %vm266_vm1, %v253_v44 }
  0x33   :  { %1073 = vmatpush3.xpose.msk.msra.mxu0 %vm68_vm0, %v55_v43 }
  0x34   :  { %1117 = vmatpush3.xpose.msk.msra.mxu1 %vm266_vm1, %v253_v44  ;;  %1074 = vmatprep.subr.msk.mxu0 %vm68_vm0, %v54_v46  ;;  %v490_v44 = vld [vmem:[%s1574_s4 + $0x10] sm:$0xff] }
  0x35   :  { %1118 = vmatprep.subr.msk.mxu1 %vm266_vm1, %v252_v47 }
  0x37   :  { %1075 = vmatpush3.xpose.msk.msra.mxu0 %vm68_vm0, %v54_v46  ;;  %v1209_v46 = vmov 0.0  }
  0x38   :  { %1119 = vmatpush3.xpose.msk.msra.mxu1 %vm266_vm1, %v252_v47  ;;  %1076 = vmatprep.subr.msk.mxu0 %vm68_vm0, %v53_v48 }
  0x39   :  { %1120 = vmatprep.subr.msk.mxu1 %vm266_vm1, %v251_v49 }
  0x3b   :  { %1077 = vmatpush3.xpose.msk.msra.mxu0 %vm68_vm0, %v53_v48  ;;  %v491_v48 = vld [vmem:[%s1574_s4 + $0x18] sm:$0xff] }
  0x3c   :  { %1121 = vmatpush3.xpose.msk.msra.mxu1 %vm266_vm1, %v251_v49  ;;  %1078 = vmatprep.subr.msk.mxu0 %vm68_vm0, %v52_v50 }
  0x3d   :  { %1122 = vmatprep.subr.msk.mxu1 %vm266_vm1, %v250_v51 }
  0x3f   :  { %1079 = vmatpush3.xpose.msk.msra.mxu0 %vm68_vm0, %v52_v50 }
  0x40   :  { %1123 = vmatpush3.xpose.msk.msra.mxu1 %vm266_vm1, %v250_v51 }
  0x42   :  { %1081 = vmatmul.mubr.msk.f32.vlgmr.msra.gmra.mxu0 %vm68_vm0, %v45_v52 }
  0x43   :  { %1125 = vmatmul.mubr.msk.f32.vlgmr.msra.gmra.mxu1 %vm266_vm1, %v247_v53  ;;  %1083 = vmatprep.mubr.msk.f32.mxu0 %vm68_vm0, %v46_v54  ;;  %v492_v53 = vld [vmem:[%s1574_s4 + $0x20] sm:$0xff] }
  0x44   :  { %1127 = vmatprep.mubr.msk.f32.mxu1 %vm266_vm1, %v248_v55 }
  0x46   :  { %1084 = vmatmul.mubr.msk.f32.gmra.mxu0 %vm68_vm0, %v47_v56 }
  0x47   :  { %1128 = vmatmul.mubr.msk.f32.gmra.mxu1 %vm266_vm1, %v249_v57  ;;  %1086 = vmatprep.mubr.msk.f32.mxu0 %vm68_vm0, %v48_v58 }
  0x48   :  { %1138 = vmatprep.mubr.msk.f32.mxu1 %vm516_vm2, %v488_v62 }
  0x4a   :  { %1087 = vmatmul.mubr.msk.f32.gmra.mxu0 %vm68_vm0, %v49_v59 }
  0x4b   :  { %1089 = vmatprep.mubr.msk.f32.mxu0 %vm68_vm0, %v50_v60 }
  0x4e   :  { %1090 = vmatmul.mubr.msk.f32.gmra.mxu0 %vm68_vm0, %v51_v61 }
  0x4f   :  { %1152 = vmatprep.mubr.msk.f32.mxu0 %vm516_vm2, %v492_v53 }
  0x80   :  { %v424_v8 = vpop.permute.xlu1 %423 }
  0x81   :  { %v434_v63 = vpop.permute.xlu0 %433 }
  0x84   :  { %v419_v21 = vpop.permute.xlu1 %418 }
  0x85   :  { %v429_v0 = vpop.permute.xlu0 %428 }
  0x92   :  { %v1515_v1 = vpop.permute.xlu0 %513 }
  0x94   :  { %v509_v54 = vpop.permute.xlu1 %508 }
  0x96   :  { %v1517_v2 = vpop.permute.xlu0 %503 }
  0x98   :  { %v499_v60 = vpop.permute.xlu1 %498 }
  0x9a   :  { %v470_v3 = vpop.permute.xlu0 %469 }
  0x9e   :  { %v465_v12 = vpop.permute.xlu0 %464 }
  0xa2   :  { %v460_v27 = vpop.permute.xlu0 %459 }
  0xa6   :  { %v455_v39 = vpop.permute.xlu0 %454 }
 0x102   :  { %v1082_v4 = vpop.f32.mrf.mxu0 }
 0x103   :  { %v1126_v5 = vpop.f32.mrf.mxu1 }
 0x104   :  { %v207_v6 = vpop.f32.mrf.mxu0  ;;  %v413_v9 = vadd.f32 %v1126_v5, %v1082_v4 }
 0x105   :  { %v393_v7 = vpop.f32.mrf.mxu1 }
 0x106   :  { %v1085_v10 = vpop.f32.mrf.mxu0  ;;  %v412_v14 = vadd.f32 %v393_v7, %v207_v6  ;;  %v437_v19 = vadd.f32 %v424_v8, %v413_v9  ;;  %v493_v8 = vld [vmem:[%s1574_s4 + $0x28] sm:$0xff]  ;;  %v494_v9 = vld [vmem:[%s1574_s4 + $0x30] sm:$0xff] }
 0x107   :  { %v1129_v11 = vpop.f32.mrf.mxu1 }
 0x108   :  { %v415_v13 = vadd.f32 %v1129_v11, %v1085_v10  ;;  %v217_v15 = vpop.f32.mrf.mxu0  ;;  %v436_v24 = vadd.f32 %v419_v21, %v412_v14  ;;  %v445_v30 = vmul.f32 0.01, %v437_v19  ;;  %vm441_vm5 = vcmp.ge.f32.partialorder %v437_v19, 0.0  ;;  %v495_v10 = vld [vmem:[%s1574_s4 + $0x38] sm:$0xff]  ;;  %v756_v11 = vld [vmem:[%s1575_s5 + $0x1] sm:$0x1] }
 0x109   :  { %v403_v16 = vpop.f32.mrf.mxu1 }
 0x10a   :  { %v439_v17 = vadd.f32 %v434_v63, %v415_v13  ;;  %v414_v18 = vadd.f32 %v403_v16, %v217_v15  ;;  %v1088_v20 = vpop.f32.mrf.mxu0  ;;  %v444_v34 = vmul.f32 0.01, %v436_v24  ;;  %vm440_vm6 = vcmp.ge.f32.partialorder %v436_v24, 0.0 }
 0x10b   :  { %v449_v36 = vsel %vm441_vm5, %v437_v19, %v445_v30  ;;  %v473_v37 = vadd.f32 %v1088_v20, %v460_v27 }
 0x10c   :  { %v438_v22 = vadd.f32 %v429_v0, %v414_v18  ;;  %vm443_vm3 = vcmp.ge.f32.partialorder %v439_v17, 0.0  ;;  %v447_v23 = vmul.f32 0.01, %v439_v17  ;;  %v227_v25 = vpop.f32.mrf.mxu0  ;;  %v448_v40 = vsel %vm440_vm6, %v436_v24, %v444_v34 }
 0x10d   :  { %v472_v42 = vadd.f32 %v455_v39, %v227_v25  ;;  %v481_v45 = vmul.f32 0.01, %v473_v37  ;;  %vm477_vm9 = vcmp.ge.f32.partialorder %v473_v37, 0.0 }
 0x10e   :  { %v451_v26 = vsel %vm443_vm3, %v439_v17, %v447_v23  ;;  %v1091_v28 = vpop.f32.mrf.mxu0  ;;  %vm442_vm4 = vcmp.ge.f32.partialorder %v438_v22, 0.0  ;;  %v446_v29 = vmul.f32 0.01, %v438_v22 }
 0x10f   :  { %1130 = vmatprep.subr.mxu1 %v451_v26  ;;  %v475_v31 = vadd.f32 %v1091_v28, %v470_v3  ;;  %v480_v49 = vmul.f32 0.01, %v472_v42  ;;  %vm476_vm10 = vcmp.ge.f32.partialorder %v472_v42, 0.0  ;;  %v485_v51 = vsel %vm477_vm9, %v473_v37, %v481_v45  ;;  %v906_v37 = vpop.permute.xlu0 %905 }
 0x110   :  { %1131 = vmatpush3.msra.mxu1 %v451_v26  ;;  %v237_v32 = vpop.f32.mrf.mxu0  ;;  %v450_v33 = vsel %vm442_vm4, %v438_v22, %v446_v29 }
 0x111   :  { %v474_v35 = vadd.f32 %v465_v12, %v237_v32  ;;  %1132 = vmatprep.subr.mxu1 %v450_v33  ;;  %v483_v38 = vmul.f32 0.01, %v475_v31  ;;  %vm479_vm7 = vcmp.ge.f32.partialorder %v475_v31, 0.0  ;;  %v484_v52 = vsel %vm476_vm10, %v472_v42, %v480_v49  ;;  %v644_v12 = vpop.permute.xlu1 %643 }
 0x112   :  { %1133 = vmatpush3.msra.mxu1 %v450_v33 }
 0x113   :  { %1134 = vmatprep.subr.mxu1 %v449_v36  ;;  %v482_v43 = vmul.f32 0.01, %v474_v35  ;;  %vm478_vm8 = vcmp.ge.f32.partialorder %v474_v35, 0.0  ;;  %v487_v47 = vsel %vm479_vm7, %v475_v31, %v483_v38  ;;  %v755_v31 = vld [vmem:[%s1575_s5] sm:$0x1]  ;;  %s1190_s5 = scalar_lea.vmem %s917_s20, 32 }
 0x114   :  { %1135 = vmatpush3.msra.mxu1 %v449_v36  ;;  %p1192_p2 = scmp.lt.s32.totalorder %s1190_s5, %s1186_s21 }
 0x115   :  { %1136 = vmatprep.subr.mxu1 %v448_v40  ;;  %v486_v50 = vsel %vm478_vm8, %v474_v35, %v482_v43  ;;  %v639_v13 = vpop.permute.xlu1 %638 }
 0x116   :  { %1137 = vmatpush3.msra.mxu1 %v448_v40  ;;  %p1193_p3 = por %p1192_p2, %p1191_p1 }
 0x117   :  { %1139 = vmatmul.mubr.msk.f32.vlgmr.msra.gmra.mxu1 %vm516_vm2, %v489_v41  ;;  %1158 = vmatprep.subr.mxu1 %v1209_v46 }
 0x118   :  { %1159 = vmatpush3.msra.mxu1 %v487_v47  ;;  %1141 = vmatprep.mubr.msk.f32.mxu1 %vm516_vm2, %v490_v44  ;;  %p1194_p4 = pnand %p1193_p3, %p1187_p0 }
 0x119   :  { %1160 = vmatprep.subr.mxu1 %v1209_v46  ;;  %v634_v14 = vpop.permute.xlu1 %633 }
 0x11a   :  { %1161 = vmatpush3.msra.mxu1 %v486_v50 }
 0x11b   :  { %1142 = vmatmul.mubr.msk.f32.gmra.mxu1 %vm516_vm2, %v491_v48  ;;  %1162 = vmatprep.subr.mxu1 %v1209_v46 }
 0x11c   :  { %1163 = vmatpush3.msra.mxu1 %v485_v51  ;;  %1166 = vmatprep.mubr.msk.f32.mxu1 %vm1210_vm15, %v1209_v46 }
 0x11d   :  { %1164 = vmatprep.subr.mxu1 %v1209_v46  ;;  %v629_v20 = vpop.permute.xlu1 %628 }
 0x11e   :  { %1165 = vmatpush3.msra.mxu1 %v484_v52 }
 0x11f   :  { %1167 = vmatmul.mubr.msk.f32.vlgmr.msra.gmra.mxu1 %vm516_vm2, %v756_v11 }
 0x1d7   :  { %v1140_v55 = vpop.f32.mrf.mxu1 }
 0x1d8   :  { %v601_v58 = vadd.f32 %v1140_v55, %v1517_v2 }
 0x1d9   :  { %v595_v56 = vpop.f32.mrf.mxu1 }
 0x1da   :  { %v596_v62 = vadd.f32 %v595_v56, %v499_v60  ;;  %v619_v3 = vmul.f32 0.01, %v601_v58  ;;  %vm615_vm13 = vcmp.ge.f32.partialorder %v601_v58, 0.0 }
 0x1db   :  { %v1143_v57 = vpop.f32.mrf.mxu1 }
 0x1dc   :  { %v611_v59 = vadd.f32 %v1143_v57, %v1515_v1  ;;  %v618_v6 = vmul.f32 0.01, %v596_v62  ;;  %vm614_vm14 = vcmp.ge.f32.partialorder %v596_v62, 0.0  ;;  %v623_v2 = vsel %vm615_vm13, %v601_v58, %v619_v3 }
 0x1dd   :  { %v605_v61 = vpop.f32.mrf.mxu1 }
 0x1de   :  { %v621_v63 = vmul.f32 0.01, %v611_v59  ;;  %v606_v0 = vadd.f32 %v605_v61, %v509_v54  ;;  %vm617_vm11 = vcmp.ge.f32.partialorder %v611_v59, 0.0  ;;  %v622_v1 = vsel %vm614_vm14, %v596_v62, %v618_v6 }
 0x1df   :  { %v826_v33 = vpop.f32.mrf.mxu1 }
 0x1e0   :  { %v620_v4 = vmul.f32 0.01, %v606_v0  ;;  %v625_v5 = vsel %vm617_vm11, %v611_v59, %v621_v63  ;;  %vm616_vm12 = vcmp.ge.f32.partialorder %v606_v0, 0.0 }
 0x1e1   :  { %1144 = vmatprep.subr.mxu0 %v625_v5  ;;  %v1168_v34 = vpop.f32.mrf.mxu1 }
 0x1e2   :  { %1145 = vmatpush3.msra.mxu0 %v625_v5  ;;  %v624_v7 = vsel %vm616_vm12, %v606_v0, %v620_v4 }
 0x1e3   :  { %1146 = vmatprep.subr.mxu0 %v624_v7 }
 0x1e4   :  { %1147 = vmatpush3.msra.mxu0 %v624_v7 }
 0x1e5   :  { %1148 = vmatprep.subr.mxu0 %v623_v2 }
 0x1e6   :  { %1149 = vmatpush3.msra.mxu0 %v623_v2 }
 0x1e7   :  { %1150 = vmatprep.subr.mxu0 %v622_v1 }
 0x1e8   :  { %1151 = vmatpush3.msra.mxu0 %v622_v1 }
 0x1e9   :  { %1153 = vmatmul.mubr.msk.f32.vlgmr.msra.gmra.mxu0 %vm516_vm2, %v493_v8  ;;  %1169 = vmatprep.subr.mxu0 %v1209_v46 }
 0x1ea   :  { %1155 = vmatprep.mubr.msk.f32.mxu0 %vm516_vm2, %v494_v9 }
 0x1ed   :  { %1156 = vmatmul.mubr.msk.f32.gmra.mxu0 %vm516_vm2, %v495_v10 }
 0x1ee   :  { %1177 = vmatprep.mubr.msk.f32.mxu0 %vm1210_vm15, %v1209_v46 }
 0x2a9   :  { %v1154_v15 = vpop.f32.mrf.mxu0 }
 0x2aa   :  { %v730_v18 = vadd.f32 %v1154_v15, %v634_v14 }
 0x2ab   :  { %v724_v16 = vpop.f32.mrf.mxu0 }
 0x2ac   :  { %v725_v22 = vadd.f32 %v724_v16, %v629_v20  ;;  %v748_v25 = vmul.f32 0.01, %v730_v18  ;;  %vm744_vm3 = vcmp.ge.f32.partialorder %v730_v18, 0.0 }
 0x2ad   :  { %v1157_v17 = vpop.f32.mrf.mxu0 }
 0x2ae   :  { %v740_v19 = vadd.f32 %v1157_v17, %v644_v12  ;;  %v747_v28 = vmul.f32 0.01, %v725_v22  ;;  %vm743_vm4 = vcmp.ge.f32.partialorder %v725_v22, 0.0  ;;  %v752_v30 = vsel %vm744_vm3, %v730_v18, %v748_v25 }
 0x2af   :  { %v734_v21 = vpop.f32.mrf.mxu0 }
 0x2b0   :  { %vm746_vm0 = vcmp.ge.f32.partialorder %v740_v19, 0.0  ;;  %v750_v23 = vmul.f32 0.01, %v740_v19  ;;  %v735_v24 = vadd.f32 %v734_v21, %v639_v13  ;;  %v751_v32 = vsel %vm743_vm4, %v725_v22, %v747_v28 }
 0x2b2   :  { %vm745_vm1 = vcmp.ge.f32.partialorder %v735_v24, 0.0  ;;  %v749_v26 = vmul.f32 0.01, %v735_v24  ;;  %v754_v27 = vsel %vm746_vm0, %v740_v19, %v750_v23 }
 0x2b3   :  { %1170 = vmatpush3.msra.mxu0 %v754_v27 }
 0x2b4   :  { %1171 = vmatprep.subr.mxu0 %v1209_v46  ;;  %v753_v29 = vsel %vm745_vm1, %v735_v24, %v749_v26 }
 0x2b5   :  { %1172 = vmatpush3.msra.mxu0 %v753_v29 }
 0x2b6   :  { %1173 = vmatprep.subr.mxu0 %v1209_v46 }
 0x2b7   :  { %1174 = vmatpush3.msra.mxu0 %v752_v30 }
 0x2b8   :  { %1175 = vmatprep.subr.mxu0 %v1209_v46 }
 0x2b9   :  { %1176 = vmatpush3.msra.mxu0 %v751_v32 }
 0x2ba   :  { %1178 = vmatmul.mubr.msk.f32.vlgmr.msra.gmra.mxu0 %vm516_vm2, %v755_v31 }
 0x37a   :  { %v899_v35 = vpop.f32.mrf.mxu0 }
 0x37b   :  { %v900_v36 = vadd.f32 %v899_v35, %v826_v33 }
 0x37c   :  { %v1179_v38 = vpop.f32.mrf.mxu0 }
 0x37d   :  { %v908_v39 = vadd.f32 %v906_v37, %v900_v36 }
 0x37f   :  { %909 = vst [vmem:[#allocation2] sm:$0x1] %v908_v39 }
 0x380   :  { %1197 = shalt.err (!%p1194_p4)
}
 0x381   :  { %919 = dma.vmem_to_hbm [thread:$0]  %s917_s20, 16, %s1577_s7, [#allocation3]  }
 0x382   :  { %1206 = dma.done.wait [#allocation3], 16  }
 0x383   :  { %1207 = vsyncadd [#allocation3], 4294967280 }
 0x384   :  { %923 = vsyncpa [#allocation3], 1 }

</bundles_post_ra>
